<compile_context>
chip_gen: v5e
topology: v5e:2x2
jax: 0.10.0
libtpu: 0.0.40
codegen_flags: <defaults>
</compile_context>

<pallas_src>
import numpy as np
import jax
import jax.numpy as jnp
from jax.experimental import pallas as pl
from jax.experimental.pallas import tpu as pltpu  # noqa: F401  (no grid needed at this toy size)

# ---- small shapes consistent with the forward pass -------------------------
B = 2             # batch (len(images))
H = W = 16        # spatial (stand-in for 224)
CIN = 3           # RGB
C_VGG = 8         # "vgg19_bn-lite" channels (stand-in for 512)
C_RES = 16        # "resnext101-lite" channels (stand-in for 2048)
C_TOT = C_VGG + C_RES           # 24
POOL = 4                        # adaptive-avg-pool grid (stand-in for VGG's 7x7)
BS = H // POOL                  # 4
HW = H * W
KK = 3 * 3 * CIN
HP, WP = H + 2, W + 2           # padded spatial
LANE_Y = W * C_TOT              # 384: conv-output lane width, index = w*C_TOT + c
VGG_FLAT = C_VGG * POOL * POOL  # 128
OUT_DIM = VGG_FLAT + C_RES      # 144
OUT_PAD = 256                   # lane-dense (2x128) padded output width
K_RAW = 3 * WP * CIN            # 162 (dy-merged contraction width)
K_PAD = 256                     # padded to a lane multiple -> unmasked MXU feeds


# ---------------------------- Pallas kernel ---------------------------------
def fused_kernel(xs_ref, t_ref, scale_ref, shift_ref, pwg_ref, phm_ref,
                 sumb_ref, o_ref):
    # xs_ref   : [B*H, 256]  K-merged, mean-padded image slabs (both batches)
    # t_ref    : [256, 384]  dy-merged Toeplitz conv weights (Normalize folded in)
    # scale/shift_ref : [1, 384]  per-(w,c) affine (conv bias + BN folded)
    # pwg_ref  : [384, 256]  bf16: w-pool + torch c-major flatten scatter (lanes 0..127)
    #                        and w-mean for resnext (lanes 128..143)
    # phm_ref  : [B*H, 256]  bf16: h pool-block selection (vgg) / 1/H (resnext)
    # sumb_ref : [B, B*H]    per-batch row-sum matrix
    # o_ref    : [B, 256]    lane-dense output slab
    # one K-merged conv matmul for both batches & both branches
    y = jnp.dot(xs_ref[...], t_ref[...],
                preferred_element_type=jnp.float32)               # [B*H, 384]
    # folded Normalize + conv bias + BN, then ReLU (both branches at once)
    y = jnp.maximum(y * scale_ref[...] + shift_ref[...], 0.0)
    # w-pool / flatten-scatter (vgg) and w-mean (resnext) in one matmul
    z = jnp.dot(y, pwg_ref[...].astype(jnp.float32),
                preferred_element_type=jnp.float32)               # [B*H, 256]
    # per-(row, lane) h pool-block selection (vgg) / h-mean weight (resnext)
    z = z * phm_ref[...].astype(jnp.float32)
    # per-batch sum over the H rows -> final [B, 256] slab, single dense store
    o_ref[...] = jnp.dot(sumb_ref[...], z, preferred_element_type=jnp.float32)


# ------------------------------ wrapper --------------------------------------
def model_forward(x_nchw, consts):
    x = jnp.transpose(x_nchw, (0, 2, 3, 1))                  # NCHW -> NHWC (layout)
    # pad with the per-channel Normalize mean so the normalize fold is exact at
    # the conv border (padded pixel == 0 in the normalized domain)
    xp = jnp.pad(x - consts["mean4"], ((0, 0), (1, 1), (1, 1), (0, 0))) + consts["mean4"]
    # K-stack the three dy-shifted slabs so the 3x3 conv is ONE matmul
    slabs = jnp.stack([xp[:, dy:dy + H] for dy in range(3)], axis=2)  # [B,H,3,WP,CIN]
    xs = slabs.reshape(B * H, K_RAW)
    xs = jnp.pad(xs, ((0, 0), (0, K_PAD - K_RAW)))           # [32, 256]
    out = pl.pallas_call(
        fused_kernel,
        out_shape=jax.ShapeDtypeStruct((B, OUT_PAD), jnp.float32),
    )(xs, consts["T"], consts["scale_row"], consts["shift_row"],
      consts["pwg"], consts["phm"], consts["sumb"])
    # torch.cat((model2(...).reshape(B,-1,1,1), model1(...)), 1).squeeze()
    return jnp.squeeze(out[:, :OUT_DIM])


# -------------------------- deterministic params ------------------------------
def init_raw_params(key):
    ks = jax.random.split(key, 8)
    w_vgg = jax.random.normal(ks[0], (3, 3, CIN, C_VGG), jnp.float32) * 0.2
    b_vgg = jax.random.normal(ks[1], (C_VGG,), jnp.float32) * 0.05
    gamma = 1.0 + 0.1 * jax.random.normal(ks[2], (C_VGG,), jnp.float32)
    beta = 0.05 * jax.random.normal(ks[3], (C_VGG,), jnp.float32)
    run_mean = 0.02 * jax.random.normal(ks[4], (C_VGG,), jnp.float32)
    run_var = 1.0 + 0.1 * jnp.abs(jax.random.normal(ks[5], (C_VGG,), jnp.float32))
    eps = 1e-5
    scale = gamma / jnp.sqrt(run_var + eps)                  # fold BN (eval mode)
    shift = (b_vgg - run_mean) * scale + beta
    w_res = jax.random.normal(ks[6], (3, 3, CIN, C_RES), jnp.float32) * 0.2
    b_res = jax.random.normal(ks[7], (C_RES,), jnp.float32) * 0.05

    pm = np.zeros((POOL * POOL, HW), np.float32)             # reference pool matrix
    for i in range(POOL):
        for j in range(POOL):
            for u in range(BS):
                for v in range(BS):
                    pm[i * POOL + j, (i * BS + u) * W + (j * BS + v)] = 1.0 / (BS * BS)

    return dict(
        w_vgg=w_vgg, scale=scale, shift=shift, w_res=w_res, b_res=b_res,
        mean=jnp.array([0.485, 0.456, 0.406], jnp.float32),
        istd=1.0 / jnp.array([0.229, 0.224, 0.225], jnp.float32),
        pool_mat=jnp.asarray(pm),
    )


def build_kernel_consts(raw):
    w_cat = np.concatenate([np.asarray(raw["w_vgg"]), np.asarray(raw["w_res"])],
                           axis=3)                                  # [3,3,CIN,C_TOT]
    mean = np.asarray(raw["mean"], np.float32)
    istd = np.asarray(raw["istd"], np.float32)
    # fold transforms.Normalize into the conv: w' = w*istd[ci]; bias' -= sum mean*istd*w
    wf = w_cat * istd[None, None, :, None]
    biasadj = -np.einsum("i,i,yxic->c", mean, istd, w_cat).astype(np.float32)
    scale_vgg = np.asarray(raw["scale"], np.float32)
    shift_vgg = np.asarray(raw["shift"], np.float32)
    b_res = np.asarray(raw["b_res"], np.float32)
    scale_all = np.concatenate([scale_vgg, np.ones((C_RES,), np.float32)])
    shift_all = np.concatenate([shift_vgg + biasadj[:C_VGG] * scale_vgg,
                                b_res + biasadj[C_VGG:]])
    scale_row = np.tile(scale_all, W).reshape(1, LANE_Y)
    shift_row = np.tile(shift_all, W).reshape(1, LANE_Y)

    # dy-merged Toeplitz conv weights, zero-padded to K_PAD contraction rows:
    # y[row, w*C_TOT+c] = xs[row, :] @ T[:, w*C_TOT+c]
    T = np.zeros((K_PAD, LANE_Y), np.float32)
    for dy in range(3):
        for dx in range(3):
            for ci in range(CIN):
                for w in range(W):
                    T[dy * WP * CIN + (w + dx) * CIN + ci,
                      w * C_TOT:(w + 1) * C_TOT] = wf[dy, dx, ci]

    # second-stage matrix: lanes 0..127 = vgg w-pool + torch c-major flatten
    # scatter (n = c*16 + i*4 + j), lanes 128..143 = resnext mean over w.
    # Entries are 0, 1/4, 1/16 -> exact in bf16.
    pwg = np.zeros((LANE_Y, OUT_PAD), np.float32)
    for n in range(VGG_FLAT):
        c = n // (POOL * POOL)
        j = n % POOL
        for w in range(j * BS, (j + 1) * BS):
            pwg[w * C_TOT + c, n] = 1.0 / BS
    for c in range(C_RES):
        for w in range(W):
            pwg[w * C_TOT + C_VGG + c, VGG_FLAT + c] = 1.0 / W

    # per-(h, lane) weights: select the correct h pool block (vgg) / 1/H (resnext)
    phm1 = np.zeros((H, OUT_PAD), np.float32)
    for h in range(H):
        for n in range(VGG_FLAT):
            i = (n % (POOL * POOL)) // POOL
            if h // BS == i:
                phm1[h, n] = 1.0 / BS
        phm1[h, VGG_FLAT:VGG_FLAT + C_RES] = 1.0 / H
    phm = np.tile(phm1, (B, 1))                                     # [B*H, 256]

    # per-batch row-sum matrix (block of ones per batch)
    sumb = np.zeros((B, B * H), np.float32)
    for b in range(B):
        sumb[b, b * H:(b + 1) * H] = 1.0

    return dict(T=jnp.asarray(T),
                scale_row=jnp.asarray(scale_row), shift_row=jnp.asarray(shift_row),
                pwg=jnp.asarray(pwg, dtype=jnp.bfloat16),
                phm=jnp.asarray(phm, dtype=jnp.bfloat16),
                sumb=jnp.asarray(sumb),
                mean4=jnp.asarray(mean.reshape(1, 1, 1, CIN)))


# ------------------------- pure-JAX reference ---------------------------------
def im2col_3x3(x_nhwc):
    xp = jnp.pad(x_nhwc, ((0, 0), (1, 1), (1, 1), (0, 0)))
    cols = []
    for dy in range(3):
        for dx in range(3):
            cols.append(xp[:, dy:dy + H, dx:dx + W, :])
    return jnp.stack(cols, axis=3).reshape(B, HW, KK)


def reference_forward(x_nchw, raw):
    x = jnp.transpose(x_nchw, (0, 2, 3, 1))
    x = (x - raw["mean"]) * raw["istd"]
    patches = im2col_3x3(x)
    y = jnp.einsum("bpk,kc->bpc", patches, raw["w_vgg"].reshape(KK, C_VGG))
    y = jnp.maximum(y * raw["scale"] + raw["shift"], 0.0)
    pooled = jnp.einsum("sp,bpc->bsc", raw["pool_mat"], y)
    vgg_flat = jnp.transpose(pooled, (0, 2, 1)).reshape(B, -1)
    yr = jnp.maximum(jnp.einsum("bpk,kc->bpc", patches,
                                raw["w_res"].reshape(KK, C_RES)) + raw["b_res"], 0.0)
    res = jnp.mean(yr, axis=1)
    return jnp.squeeze(jnp.concatenate([vgg_flat, res], axis=1))


if __name__ == "__main__":
    key = jax.random.PRNGKey(0)
    pkey, xkey = jax.random.split(key)
    raw = init_raw_params(pkey)
    consts = build_kernel_consts(raw)

    # stand-in for stacked, ToTensor()'d images: [B, 3, H, W] in [0, 1], NCHW
    x = jax.random.uniform(xkey, (B, CIN, H, W), dtype=jnp.float32)

    fwd = jax.jit(model_forward)
    out = jax.block_until_ready(fwd(x, consts))
    assert out.shape == (B, OUT_DIM), out.shape

    ref = jax.block_until_ready(reference_forward(x, raw))
    np.testing.assert_allclose(np.asarray(out), np.asarray(ref), rtol=2e-3, atol=2e-3)

    print("KERNEL_OK")
</pallas_src>

<mosaic_0001>
module attributes {stable_mosaic.version = 11 : i64} {
  func.func @fused_kernel(%arg0: memref<32x256xf32, #tpu.memory_space<vmem>>, %arg1: memref<256x384xf32, #tpu.memory_space<vmem>>, %arg2: memref<1x384xf32, #tpu.memory_space<vmem>>, %arg3: memref<1x384xf32, #tpu.memory_space<vmem>>, %arg4: memref<384x256xbf16, #tpu.memory_space<vmem>>, %arg5: memref<32x256xbf16, #tpu.memory_space<vmem>>, %arg6: memref<2x32xf32, #tpu.memory_space<vmem>>, %arg7: memref<2x256xf32, #tpu.memory_space<vmem>>) attributes {dimension_semantics = [], scalar_prefetch = 0 : i64, scratch_operands = 0 : i64, tpu.core_type = #tpu.core_type<tc>} {
    %c0 = arith.constant 0 : index
    %c0_0 = arith.constant 0 : index
    %0 = vector.load %arg0[%c0, %c0_0] : memref<32x256xf32, #tpu.memory_space<vmem>>, vector<32x256xf32>
    %c0_1 = arith.constant 0 : index
    %c0_2 = arith.constant 0 : index
    %1 = vector.load %arg1[%c0_1, %c0_2] : memref<256x384xf32, #tpu.memory_space<vmem>>, vector<256x384xf32>
    %cst = arith.constant dense<0.000000e+00> : vector<32x384xf32>
    %2 = tpu.matmul %0, %1, %cst {dimension_numbers = #tpu.dot_dimension_numbers<[1], [0], [0], [1], [0, 0, 1, 1], [], []>} : vector<32x256xf32>, vector<256x384xf32>, vector<32x384xf32> -> vector<32x384xf32>
    %c0_3 = arith.constant 0 : index
    %c0_4 = arith.constant 0 : index
    %3 = vector.load %arg2[%c0_3, %c0_4] : memref<1x384xf32, #tpu.memory_space<vmem>>, vector<1x384xf32>
    %4 = vector.broadcast %3 : vector<1x384xf32> to vector<32x384xf32>
    %5 = arith.mulf %2, %4 : vector<32x384xf32>
    %c0_5 = arith.constant 0 : index
    %c0_6 = arith.constant 0 : index
    %6 = vector.load %arg3[%c0_5, %c0_6] : memref<1x384xf32, #tpu.memory_space<vmem>>, vector<1x384xf32>
    %7 = vector.broadcast %6 : vector<1x384xf32> to vector<32x384xf32>
    %8 = arith.addf %5, %7 : vector<32x384xf32>
    %cst_7 = arith.constant 0.000000e+00 : f32
    %9 = vector.broadcast %cst_7 : f32 to vector<32x384xf32>
    %10 = arith.maximumf %8, %9 : vector<32x384xf32>
    %c0_8 = arith.constant 0 : index
    %c0_9 = arith.constant 0 : index
    %11 = vector.load %arg4[%c0_8, %c0_9] : memref<384x256xbf16, #tpu.memory_space<vmem>>, vector<384x256xbf16>
    %12 = arith.extf %11 : vector<384x256xbf16> to vector<384x256xf32>
    %cst_10 = arith.constant dense<0.000000e+00> : vector<32x256xf32>
    %13 = tpu.matmul %10, %12, %cst_10 {dimension_numbers = #tpu.dot_dimension_numbers<[1], [0], [0], [1], [0, 0, 1, 1], [], []>} : vector<32x384xf32>, vector<384x256xf32>, vector<32x256xf32> -> vector<32x256xf32>
    %c0_11 = arith.constant 0 : index
    %c0_12 = arith.constant 0 : index
    %14 = vector.load %arg5[%c0_11, %c0_12] : memref<32x256xbf16, #tpu.memory_space<vmem>>, vector<32x256xbf16>
    %15 = arith.extf %14 : vector<32x256xbf16> to vector<32x256xf32>
    %16 = arith.mulf %13, %15 : vector<32x256xf32>
    %c0_13 = arith.constant 0 : index
    %c0_14 = arith.constant 0 : index
    %17 = vector.load %arg6[%c0_13, %c0_14] : memref<2x32xf32, #tpu.memory_space<vmem>>, vector<2x32xf32>
    %cst_15 = arith.constant dense<0.000000e+00> : vector<2x256xf32>
    %18 = tpu.matmul %17, %16, %cst_15 {dimension_numbers = #tpu.dot_dimension_numbers<[1], [0], [0], [1], [0, 0, 1, 1], [], []>} : vector<2x32xf32>, vector<32x256xf32>, vector<2x256xf32> -> vector<2x256xf32>
    %c0_16 = arith.constant 0 : index
    %c0_17 = arith.constant 0 : index
    %19 = vector.load %arg7[%c0_16, %c0_17] : memref<2x256xf32, #tpu.memory_space<vmem>>, vector<2x256xf32>
    tpu.vector_store %arg7[%c0_16, %c0_17], %18 {strides = array<i32>} : memref<2x256xf32, #tpu.memory_space<vmem>>, vector<2x256xf32>,
    return
  }
}

</mosaic_0001>

<bundles_post_ra>
// kernel: model_forward.1
= control target key start
LH: loop header
LB: loop body
LE: loop exit
PB: predicated region body
PF: predicated region fallthrough
CT: control target
= control target key end

     0   :  { %s1456_s0 = inlined_call_operand.vmem [shape: f32[32,256], index: 0, kind: input, shape index: {}]   ;;  %s1457_s1 = inlined_call_operand.vmem [shape: f32[256,384], index: 1, kind: input, shape index: {}]   ;;  %s1458_s2 = inlined_call_operand.vmem [shape: f32[1,384], index: 2, kind: input, shape index: {}]   ;;  %s1459_s3 = inlined_call_operand.vmem [shape: f32[1,384], index: 3, kind: input, shape index: {}]   ;;  %s1460_s4 = inlined_call_operand.vmem [shape: bf16[384,256], index: 4, kind: input, shape index: {}]   ;;  %s1461_s5 = inlined_call_operand.vmem [shape: bf16[32,256], index: 5, kind: input, shape index: {}]   ;;  %s1462_s6 = inlined_call_operand.vmem [shape: f32[2,32], index: 6, kind: input, shape index: {}]   ;;  %s1463_s7 = inlined_call_operand.hbm [shape: f32[2,256], index: 7, kind: output, shape index: {}]  }
   0x1   :  { %v80_v0 = vld [vmem:[%s1457_s1 + $0x168] sm:$0xff]  ;;  %v81_v2 = vld [vmem:[%s1457_s1 + $0x170] sm:$0xff]  ;;  %v78_v6 = vld [vmem:[%s1457_s1 + $0x158] sm:$0xff] }
   0x2   :  { %v128_v1 = vld [vmem:[%s1457_s1 + $0x2e8] sm:$0xff]  ;;  %131 = vmatpush.msra.mxu0 %v80_v0  ;;  %v129_v3 = vld [vmem:[%s1457_s1 + $0x2f0] sm:$0xff]  ;;  %189 = vmatpush.msra.mxu2 %v81_v2  ;;  %v126_v7 = vld [vmem:[%s1457_s1 + $0x2d8] sm:$0xff] }
   0x3   :  { %160 = vmatpush.msra.mxu1 %v128_v1  ;;  %v77_v4 = vld [vmem:[%s1457_s1 + $0x150] sm:$0xff]  ;;  %218 = vmatpush.msra.mxu3 %v129_v3  ;;  %v74_v8 = vld [vmem:[%s1457_s1 + $0x138] sm:$0xff]  ;;  %v75_v10 = vld [vmem:[%s1457_s1 + $0x140] sm:$0xff] }
   0x4   :  { %v125_v5 = vld [vmem:[%s1457_s1 + $0x2d0] sm:$0xff]  ;;  %132 = vmatpush.msra.mxu0 %v77_v4  ;;  %v122_v9 = vld [vmem:[%s1457_s1 + $0x2b8] sm:$0xff]  ;;  %v123_v11 = vld [vmem:[%s1457_s1 + $0x2c0] sm:$0xff]  ;;  %190 = vmatpush.msra.mxu2 %v78_v6 }
   0x5   :  { %161 = vmatpush.msra.mxu1 %v125_v5  ;;  %219 = vmatpush.msra.mxu3 %v126_v7  ;;  %v71_v12 = vld [vmem:[%s1457_s1 + $0x120] sm:$0xff]  ;;  %v72_v14 = vld [vmem:[%s1457_s1 + $0x128] sm:$0xff]  ;;  %v69_v18 = vld [vmem:[%s1457_s1 + $0x110] sm:$0xff] }
   0x6   :  { %v119_v13 = vld [vmem:[%s1457_s1 + $0x2a0] sm:$0xff]  ;;  %133 = vmatpush.msra.mxu0 %v74_v8  ;;  %v120_v15 = vld [vmem:[%s1457_s1 + $0x2a8] sm:$0xff]  ;;  %191 = vmatpush.msra.mxu2 %v75_v10  ;;  %v117_v19 = vld [vmem:[%s1457_s1 + $0x290] sm:$0xff] }
   0x7   :  { %162 = vmatpush.msra.mxu1 %v122_v9  ;;  %220 = vmatpush.msra.mxu3 %v123_v11  ;;  %v68_v16 = vld [vmem:[%s1457_s1 + $0x108] sm:$0xff]  ;;  %v65_v20 = vld [vmem:[%s1457_s1 + $0xf0] sm:$0xff]  ;;  %v66_v22 = vld [vmem:[%s1457_s1 + $0xf8] sm:$0xff] }
   0x8   :  { %v116_v17 = vld [vmem:[%s1457_s1 + $0x288] sm:$0xff]  ;;  %134 = vmatpush.msra.mxu0 %v71_v12  ;;  %192 = vmatpush.msra.mxu2 %v72_v14  ;;  %v113_v21 = vld [vmem:[%s1457_s1 + $0x270] sm:$0xff]  ;;  %v114_v23 = vld [vmem:[%s1457_s1 + $0x278] sm:$0xff] }
   0x9   :  { %163 = vmatpush.msra.mxu1 %v119_v13  ;;  %221 = vmatpush.msra.mxu3 %v120_v15  ;;  %v62_v24 = vld [vmem:[%s1457_s1 + $0xd8] sm:$0xff]  ;;  %v63_v26 = vld [vmem:[%s1457_s1 + $0xe0] sm:$0xff]  ;;  %v60_v30 = vld [vmem:[%s1457_s1 + $0xc8] sm:$0xff] }
   0xa   :  { %135 = vmatpush.msra.mxu0 %v68_v16  ;;  %193 = vmatpush.msra.mxu2 %v69_v18  ;;  %v110_v25 = vld [vmem:[%s1457_s1 + $0x258] sm:$0xff]  ;;  %v111_v27 = vld [vmem:[%s1457_s1 + $0x260] sm:$0xff]  ;;  %v108_v31 = vld [vmem:[%s1457_s1 + $0x248] sm:$0xff] }
   0xb   :  { %164 = vmatpush.msra.mxu1 %v116_v17  ;;  %222 = vmatpush.msra.mxu3 %v117_v19  ;;  %v59_v28 = vld [vmem:[%s1457_s1 + $0xc0] sm:$0xff]  ;;  %v56_v32 = vld [vmem:[%s1457_s1 + $0xa8] sm:$0xff]  ;;  %v57_v34 = vld [vmem:[%s1457_s1 + $0xb0] sm:$0xff] }
   0xc   :  { %136 = vmatpush.msra.mxu0 %v65_v20  ;;  %194 = vmatpush.msra.mxu2 %v66_v22  ;;  %v107_v29 = vld [vmem:[%s1457_s1 + $0x240] sm:$0xff]  ;;  %v104_v33 = vld [vmem:[%s1457_s1 + $0x228] sm:$0xff]  ;;  %v105_v35 = vld [vmem:[%s1457_s1 + $0x230] sm:$0xff] }
   0xd   :  { %165 = vmatpush.msra.mxu1 %v113_v21  ;;  %223 = vmatpush.msra.mxu3 %v114_v23  ;;  %v53_v36 = vld [vmem:[%s1457_s1 + $0x90] sm:$0xff]  ;;  %v54_v38 = vld [vmem:[%s1457_s1 + $0x98] sm:$0xff]  ;;  %v51_v42 = vld [vmem:[%s1457_s1 + $0x80] sm:$0xff] }
   0xe   :  { %137 = vmatpush.msra.mxu0 %v62_v24  ;;  %195 = vmatpush.msra.mxu2 %v63_v26  ;;  %v101_v37 = vld [vmem:[%s1457_s1 + $0x210] sm:$0xff]  ;;  %v102_v39 = vld [vmem:[%s1457_s1 + $0x218] sm:$0xff]  ;;  %v99_v43 = vld [vmem:[%s1457_s1 + $0x200] sm:$0xff] }
   0xf   :  { %166 = vmatpush.msra.mxu1 %v110_v25  ;;  %224 = vmatpush.msra.mxu3 %v111_v27  ;;  %v50_v40 = vld [vmem:[%s1457_s1 + $0x78] sm:$0xff]  ;;  %v47_v44 = vld [vmem:[%s1457_s1 + $0x60] sm:$0xff]  ;;  %v48_v46 = vld [vmem:[%s1457_s1 + $0x68] sm:$0xff] }
  0x10   :  { %138 = vmatpush.msra.mxu0 %v59_v28  ;;  %196 = vmatpush.msra.mxu2 %v60_v30  ;;  %v98_v41 = vld [vmem:[%s1457_s1 + $0x1f8] sm:$0xff]  ;;  %v95_v45 = vld [vmem:[%s1457_s1 + $0x1e0] sm:$0xff]  ;;  %v96_v47 = vld [vmem:[%s1457_s1 + $0x1e8] sm:$0xff] }
  0x11   :  { %167 = vmatpush.msra.mxu1 %v107_v29  ;;  %225 = vmatpush.msra.mxu3 %v108_v31  ;;  %v44_v48 = vld [vmem:[%s1457_s1 + $0x48] sm:$0xff]  ;;  %v45_v50 = vld [vmem:[%s1457_s1 + $0x50] sm:$0xff]  ;;  %v42_v54 = vld [vmem:[%s1457_s1 + $0x38] sm:$0xff] }
  0x12   :  { %139 = vmatpush.msra.mxu0 %v56_v32  ;;  %197 = vmatpush.msra.mxu2 %v57_v34  ;;  %v92_v49 = vld [vmem:[%s1457_s1 + $0x1c8] sm:$0xff]  ;;  %v93_v51 = vld [vmem:[%s1457_s1 + $0x1d0] sm:$0xff]  ;;  %v90_v55 = vld [vmem:[%s1457_s1 + $0x1b8] sm:$0xff] }
  0x13   :  { %168 = vmatpush.msra.mxu1 %v104_v33  ;;  %226 = vmatpush.msra.mxu3 %v105_v35  ;;  %v41_v52 = vld [vmem:[%s1457_s1 + $0x30] sm:$0xff]  ;;  %v38_v56 = vld [vmem:[%s1457_s1 + $0x18] sm:$0xff]  ;;  %v39_v58 = vld [vmem:[%s1457_s1 + $0x20] sm:$0xff] }
  0x14   :  { %140 = vmatpush.msra.mxu0 %v53_v36  ;;  %198 = vmatpush.msra.mxu2 %v54_v38  ;;  %v89_v53 = vld [vmem:[%s1457_s1 + $0x1b0] sm:$0xff]  ;;  %v86_v57 = vld [vmem:[%s1457_s1 + $0x198] sm:$0xff]  ;;  %v87_v59 = vld [vmem:[%s1457_s1 + $0x1a0] sm:$0xff] }
  0x15   :  { %169 = vmatpush.msra.mxu1 %v101_v37  ;;  %227 = vmatpush.msra.mxu3 %v102_v39  ;;  %v35_v60 = vld [vmem:[%s1457_s1] sm:$0xff]  ;;  %v36_v62 = vld [vmem:[%s1457_s1 + $0x8] sm:$0xff]  ;;  %v82_v2 = vld [vmem:[%s1457_s1 + $0x178] sm:$0xff] }
  0x16   :  { %141 = vmatpush.msra.mxu0 %v50_v40  ;;  %199 = vmatpush.msra.mxu2 %v51_v42  ;;  %v83_v61 = vld [vmem:[%s1457_s1 + $0x180] sm:$0xff]  ;;  %v84_v63 = vld [vmem:[%s1457_s1 + $0x188] sm:$0xff]  ;;  %v130_v3 = vld [vmem:[%s1457_s1 + $0x2f8] sm:$0xff] }
  0x17   :  { %170 = vmatpush.msra.mxu1 %v98_v41  ;;  %228 = vmatpush.msra.mxu3 %v99_v43  ;;  %v1028_v0 = vld [vmem:[%s1456_s0] sm:$0xff]  ;;  %v1033_v1 = vld [vmem:[%s1456_s0 + $0x8] sm:$0xff] }
  0x18   :  { %142 = vmatpush.msra.mxu0 %v47_v44  ;;  %200 = vmatpush.msra.mxu2 %v48_v46  ;;  %v79_v4 = vld [vmem:[%s1457_s1 + $0x160] sm:$0xff] }
  0x19   :  { %171 = vmatpush.msra.mxu1 %v95_v45  ;;  %229 = vmatpush.msra.mxu3 %v96_v47  ;;  %v127_v5 = vld [vmem:[%s1457_s1 + $0x2e0] sm:$0xff] }
  0x1a   :  { %143 = vmatpush.msra.mxu0 %v44_v48  ;;  %201 = vmatpush.msra.mxu2 %v45_v50 }
  0x1b   :  { %172 = vmatpush.msra.mxu1 %v92_v49  ;;  %230 = vmatpush.msra.mxu3 %v93_v51 }
  0x1c   :  { %144 = vmatpush.msra.mxu0 %v41_v52  ;;  %202 = vmatpush.msra.mxu2 %v42_v54 }
  0x1d   :  { %173 = vmatpush.msra.mxu1 %v89_v53  ;;  %231 = vmatpush.msra.mxu3 %v90_v55 }
  0x1e   :  { %145 = vmatpush.msra.mxu0 %v38_v56  ;;  %203 = vmatpush.msra.mxu2 %v39_v58 }
  0x1f   :  { %174 = vmatpush.msra.mxu1 %v86_v57  ;;  %232 = vmatpush.msra.mxu3 %v87_v59 }
  0x20   :  { %146 = vmatpush.msra.mxu0 %v35_v60  ;;  %204 = vmatpush.msra.mxu2 %v36_v62 }
  0x21   :  { %175 = vmatpush.msra.mxu1 %v83_v61  ;;  %233 = vmatpush.msra.mxu3 %v84_v63 }
  0x22   :  { %147 = vmatmul.f32.vlgmr.msra.gmra.mxu0 %v1028_v0  ;;  %176 = vmatmul.f32.vlgmr.msra.gmra.mxu1 %v1033_v1 }
  0x23   :  { %205 = vmatmul.f32.vlgmr.msra.gmra.mxu2 %v1028_v0  ;;  %234 = vmatmul.f32.vlgmr.msra.gmra.mxu3 %v1033_v1 }
  0x24   :  { %12 = vsyncpa [#allocation3], 0  ;;  %247 = vmatpush.msrb.mxu0 %v82_v2  ;;  %276 = vmatpush.msrb.mxu1 %v130_v3  ;;  %v76_v6 = vld [vmem:[%s1457_s1 + $0x148] sm:$0xff]  ;;  %v73_v8 = vld [vmem:[%s1457_s1 + $0x130] sm:$0xff]  ;;  %vm696_vm0 = vcmask 261120   ;;  %s754_s10 = sshll.u32 %s1463_s7, 4  ;;  %s755_s10 = int_to_ptr.hbm [resolvable:$true] %s754_s10 }
  0x25   :  { %v124_v7 = vld [vmem:[%s1457_s1 + $0x2c8] sm:$0xff]  ;;  %v121_v9 = vld [vmem:[%s1457_s1 + $0x2b0] sm:$0xff]  ;;  %v1071_v11 = vld [vmem:[%s1456_s0 + $0x18] sm:$0xff]  ;;  %vm743_vm1 = vcmask 1041408  }
  0x26   :  { %248 = vmatpush.msrb.mxu0 %v79_v4  ;;  %277 = vmatpush.msrb.mxu1 %v127_v5  ;;  %v1066_v10 = vld [vmem:[%s1456_s0 + $0x10] sm:$0xff]  ;;  %v70_v12 = vld [vmem:[%s1457_s1 + $0x118] sm:$0xff]  ;;  %v67_v14 = vld [vmem:[%s1457_s1 + $0x100] sm:$0xff] }
  0x27   :  { %v118_v13 = vld [vmem:[%s1457_s1 + $0x298] sm:$0xff]  ;;  %v115_v15 = vld [vmem:[%s1457_s1 + $0x280] sm:$0xff]  ;;  %v64_v16 = vld [vmem:[%s1457_s1 + $0xe8] sm:$0xff] }
  0x28   :  { %249 = vmatpush.msrb.mxu0 %v76_v6  ;;  %278 = vmatpush.msrb.mxu1 %v124_v7  ;;  %v112_v17 = vld [vmem:[%s1457_s1 + $0x268] sm:$0xff]  ;;  %v61_v18 = vld [vmem:[%s1457_s1 + $0xd0] sm:$0xff]  ;;  %v1104_v20 = vld [vmem:[%s1456_s0 + $0x20] sm:$0xff] }
  0x29   :  { %v109_v19 = vld [vmem:[%s1457_s1 + $0x250] sm:$0xff]  ;;  %v1109_v21 = vld [vmem:[%s1456_s0 + $0x28] sm:$0xff]  ;;  %v58_v22 = vld [vmem:[%s1457_s1 + $0xb8] sm:$0xff] }
  0x2a   :  { %250 = vmatpush.msrb.mxu0 %v73_v8  ;;  %279 = vmatpush.msrb.mxu1 %v121_v9  ;;  %v106_v23 = vld [vmem:[%s1457_s1 + $0x238] sm:$0xff]  ;;  %v55_v24 = vld [vmem:[%s1457_s1 + $0xa0] sm:$0xff]  ;;  %v52_v26 = vld [vmem:[%s1457_s1 + $0x88] sm:$0xff] }
  0x2b   :  { %150 = vmatmul.f32.gmra.mxu0 %v1066_v10  ;;  %179 = vmatmul.f32.gmra.mxu1 %v1071_v11  ;;  %v103_v25 = vld [vmem:[%s1457_s1 + $0x220] sm:$0xff]  ;;  %v100_v27 = vld [vmem:[%s1457_s1 + $0x208] sm:$0xff]  ;;  %v49_v28 = vld [vmem:[%s1457_s1 + $0x70] sm:$0xff] }
  0x2c   :  { %208 = vmatmul.f32.gmra.mxu2 %v1066_v10  ;;  %237 = vmatmul.f32.gmra.mxu3 %v1071_v11  ;;  %v97_v29 = vld [vmem:[%s1457_s1 + $0x1f0] sm:$0xff]  ;;  %v1147_v31 = vld [vmem:[%s1456_s0 + $0x38] sm:$0xff]  ;;  %v43_v34 = vld [vmem:[%s1457_s1 + $0x40] sm:$0xff] }
  0x2d   :  { %251 = vmatpush.msrb.mxu0 %v70_v12  ;;  %280 = vmatpush.msrb.mxu1 %v118_v13  ;;  %v1142_v30 = vld [vmem:[%s1456_s0 + $0x30] sm:$0xff]  ;;  %v46_v32 = vld [vmem:[%s1457_s1 + $0x58] sm:$0xff]  ;;  %v91_v35 = vld [vmem:[%s1457_s1 + $0x1c0] sm:$0xff] }
  0x2e   :  { %v94_v33 = vld [vmem:[%s1457_s1 + $0x1d8] sm:$0xff]  ;;  %v371_v37 = vld [vmem:[%s1460_s4 + $0x70] sm:$0xff]  ;;  %v40_v40 = vld [vmem:[%s1457_s1 + $0x28] sm:$0xff] }
  0x2f   :  { %252 = vmatpush.msrb.mxu0 %v67_v14  ;;  %281 = vmatpush.msrb.mxu1 %v115_v15  ;;  %v372_v36 = vld [vmem:[%s1460_s4 + $0x78] sm:$0xff]  ;;  %v88_v41 = vld [vmem:[%s1457_s1 + $0x1a8] sm:$0xff]  ;;  %v433_v42 = vunpack.c.l.bf16 %v371_v37  ;;  %v1189_v45 = vld [vmem:[%s1460_s4 + $0xf0] sm:$0xff]  ;;  %v434_v54 = vunpack.c.h.bf16 %v371_v37 }
  0x30   :  { %v435_v38 = vunpack.c.l.bf16 %v372_v36  ;;  %v1174_v39 = vld [vmem:[%s1460_s4 + $0xf8] sm:$0xff]  ;;  %v370_v43 = vld [vmem:[%s1460_s4 + $0x68] sm:$0xff]  ;;  %v37_v46 = vld [vmem:[%s1457_s1 + $0x10] sm:$0xff]  ;;  %v436_v49 = vunpack.c.h.bf16 %v372_v36  ;;  %v465_v53 = vunpack.c.l.bf16 %v1189_v45 }
  0x31   :  { %253 = vmatpush.msrb.mxu0 %v64_v16  ;;  %282 = vmatpush.msrb.mxu1 %v112_v17  ;;  %v467_v44 = vunpack.c.l.bf16 %v1174_v39  ;;  %v85_v47 = vld [vmem:[%s1457_s1 + $0x190] sm:$0xff]  ;;  %v369_v48 = vld [vmem:[%s1460_s4 + $0x60] sm:$0xff]  ;;  %v431_v50 = vunpack.c.l.bf16 %v370_v43  ;;  %v1203_v51 = vld [vmem:[%s1460_s4 + $0xe8] sm:$0xff]  ;;  %v432_v59 = vunpack.c.h.bf16 %v370_v43 }
  0x32   :  { %501 = vmatpush.msrb.mxu2 %v435_v38  ;;  %v368_v52 = vld [vmem:[%s1460_s4 + $0x58] sm:$0xff]  ;;  %v429_v55 = vunpack.c.l.bf16 %v369_v48  ;;  %v1212_v56 = vld [vmem:[%s1460_s4 + $0xe0] sm:$0xff]  ;;  %v367_v57 = vld [vmem:[%s1460_s4 + $0x50] sm:$0xff]  ;;  %v463_v58 = vunpack.c.l.bf16 %v1203_v51  ;;  %v430_v63 = vunpack.c.h.bf16 %v369_v48 }
  0x33   :  { %254 = vmatpush.msrb.mxu0 %v61_v18  ;;  %283 = vmatpush.msrb.mxu1 %v109_v19  ;;  %v427_v60 = vunpack.c.l.bf16 %v368_v52  ;;  %v366_v61 = vld [vmem:[%s1460_s4 + $0x48] sm:$0xff]  ;;  %v461_v62 = vunpack.c.l.bf16 %v1212_v56  ;;  %v365_v2 = vld [vmem:[%s1460_s4 + $0x40] sm:$0xff]  ;;  %v428_v3 = vunpack.c.h.bf16 %v368_v52  ;;  %v1235_v5 = vld [vmem:[%s1460_s4 + $0xd0] sm:$0xff]  ;;  %v426_v8 = vunpack.c.h.bf16 %v367_v57 }
  0x34   :  { %153 = vmatmul.f32.gmra.mxu0 %v1104_v20  ;;  %182 = vmatmul.f32.gmra.mxu1 %v1109_v21  ;;  %v423_v4 = vunpack.c.l.bf16 %v366_v61  ;;  %v364_v7 = vld [vmem:[%s1460_s4 + $0x38] sm:$0xff]  ;;  %v421_v9 = vunpack.c.l.bf16 %v365_v2  ;;  %v1244_v12 = vld [vmem:[%s1460_s4 + $0xc8] sm:$0xff]  ;;  %v457_v13 = vunpack.c.l.bf16 %v1235_v5  ;;  %v363_v14 = vld [vmem:[%s1460_s4 + $0x30] sm:$0xff]  ;;  %v424_v15 = vunpack.c.h.bf16 %v366_v61 }
  0x35   :  { %211 = vmatmul.f32.gmra.mxu2 %v1104_v20  ;;  %240 = vmatmul.f32.gmra.mxu3 %v1109_v21  ;;  %v419_v16 = vunpack.c.l.bf16 %v364_v7  ;;  %v455_v17 = vunpack.c.l.bf16 %v1244_v12  ;;  %v362_v18 = vld [vmem:[%s1460_s4 + $0x28] sm:$0xff]  ;;  %v417_v19 = vunpack.c.l.bf16 %v363_v14  ;;  %v1309_v48 = vld [vmem:[%s1460_s4 + $0x98] sm:$0xff] }
  0x36   :  { %255 = vmatpush.msrb.mxu0 %v58_v22  ;;  %284 = vmatpush.msrb.mxu1 %v106_v23  ;;  %v415_v22 = vunpack.c.l.bf16 %v362_v18  ;;  %v1290_v36 = vld [vmem:[%s1460_s4 + $0xa8] sm:$0xff]  ;;  %v443_v52 = vunpack.c.l.bf16 %v1309_v48 }
  0x37   :  { %502 = vmatpush.msrb.mxu2 %v433_v42  ;;  %530 = vmatpush.msrb.mxu3 %v467_v44  ;;  %v1299_v42 = vld [vmem:[%s1460_s4 + $0xa0] sm:$0xff] }
  0x38   :  { %256 = vmatpush.msrb.mxu0 %v55_v24  ;;  %285 = vmatpush.msrb.mxu1 %v103_v25  ;;  %v420_v24 = vunpack.c.h.bf16 %v364_v7  ;;  %v418_v25 = vunpack.c.h.bf16 %v363_v14  ;;  %v445_v44 = vunpack.c.l.bf16 %v1299_v42 }
  0x39   :  { %503 = vmatpush.msrb.mxu2 %v431_v50  ;;  %531 = vmatpush.msrb.mxu3 %v465_v53  ;;  %v404_v53 = vld [vmem:[%s1460_s4 + $0x178] sm:$0xff] }
  0x3a   :  { %257 = vmatpush.msrb.mxu0 %v52_v26  ;;  %286 = vmatpush.msrb.mxu1 %v100_v27  ;;  %v416_v26 = vunpack.c.h.bf16 %v362_v18  ;;  %v361_v27 = vld [vmem:[%s1460_s4 + $0x20] sm:$0xff] }
  0x3b   :  { %504 = vmatpush.msrb.mxu2 %v429_v55  ;;  %532 = vmatpush.msrb.mxu3 %v463_v58  ;;  %v1325_v58 = vld [vmem:[%s1460_s4 + $0x88] sm:$0xff] }
  0x3c   :  { %258 = vmatpush.msrb.mxu0 %v49_v28  ;;  %287 = vmatpush.msrb.mxu1 %v97_v29  ;;  %v414_v29 = vunpack.c.h.bf16 %v361_v27  ;;  %v439_v61 = vunpack.c.l.bf16 %v1325_v58 }
  0x3d   :  { %156 = vmatmul.f32.gmra.mxu0 %v1142_v30  ;;  %185 = vmatmul.f32.gmra.mxu1 %v1147_v31 }
  0x3e   :  { %214 = vmatmul.f32.gmra.mxu2 %v1142_v30  ;;  %243 = vmatmul.f32.gmra.mxu3 %v1147_v31 }
  0x3f   :  { %259 = vmatpush.msrb.mxu0 %v46_v32  ;;  %288 = vmatpush.msrb.mxu1 %v94_v33  ;;  %v360_v32 = vld [vmem:[%s1460_s4 + $0x18] sm:$0xff] }
  0x40   :  { %505 = vmatpush.msrb.mxu2 %v427_v60  ;;  %533 = vmatpush.msrb.mxu3 %v461_v62  ;;  %v411_v33 = vunpack.c.l.bf16 %v360_v32  ;;  %v499_v60 = vunpack.c.l.bf16 %v404_v53  ;;  %v464_v62 = vunpack.c.h.bf16 %v1203_v51  ;;  %v401_v51 = vld [vmem:[%s1460_s4 + $0x160] sm:$0xff] }
  0x41   :  { %260 = vmatpush.msrb.mxu0 %v43_v34  ;;  %289 = vmatpush.msrb.mxu1 %v91_v35  ;;  %v412_v34 = vunpack.c.h.bf16 %v360_v32  ;;  %v493_v7 = vunpack.c.l.bf16 %v401_v51 }
  0x43   :  { %261 = vmatpush.msrb.mxu0 %v40_v40  ;;  %290 = vmatpush.msrb.mxu1 %v88_v41  ;;  %v447_v40 = vunpack.c.l.bf16 %v1290_v36  ;;  %v358_v41 = vld [vmem:[%s1460_s4 + $0x8] sm:$0xff] }
  0x44   :  { %v407_v43 = vunpack.c.l.bf16 %v358_v41 }
  0x45   :  { %262 = vmatpush.msrb.mxu0 %v37_v46  ;;  %291 = vmatpush.msrb.mxu1 %v85_v47  ;;  %v468_v46 = vunpack.c.h.bf16 %v1174_v39  ;;  %v357_v47 = vld [vmem:[%s1460_s4] sm:$0xff]  ;;  %v1315_v39 = vld [vmem:[%s1460_s4 + $0x90] sm:$0xff] }
  0x46   :  { %263 = vmatmul.f32.vlgmr.msrb.gmra.mxu0 %v1028_v0  ;;  %292 = vmatmul.f32.vlgmr.msrb.gmra.mxu1 %v1033_v1  ;;  %v425_v0 = vunpack.c.l.bf16 %v367_v57  ;;  %v1227_v1 = vld [vmem:[%s1460_s4 + $0xd8] sm:$0xff]  ;;  %v405_v50 = vunpack.c.l.bf16 %v357_v47  ;;  %v406_v55 = vunpack.c.h.bf16 %v357_v47  ;;  %v441_v57 = vunpack.c.l.bf16 %v1315_v39 }
  0x47   :  { %588 = vmatpush.msra.mxu1 %v436_v49  ;;  %v459_v6 = vunpack.c.l.bf16 %v1227_v1  ;;  %v408_v49 = vunpack.c.h.bf16 %v358_v41  ;;  %559 = vmatpush.msra.mxu0 %v499_v60 }
  0x48   :  { %506 = vmatpush.msrb.mxu2 %v425_v0  ;;  %v402_v0 = vld [vmem:[%s1460_s4 + $0x168] sm:$0xff] }
  0x49   :  { %589 = vmatpush.msra.mxu1 %v434_v54  ;;  %534 = vmatpush.msrb.mxu3 %v459_v6  ;;  %v466_v54 = vunpack.c.h.bf16 %v1189_v45  ;;  %v460_v6 = vunpack.c.h.bf16 %v1227_v1  ;;  %v399_v1 = vld [vmem:[%s1460_s4 + $0x150] sm:$0xff] }
  0x4a   :  { %507 = vmatpush.msrb.mxu2 %v423_v4  ;;  %v495_v4 = vunpack.c.l.bf16 %v402_v0 }
  0x4b   :  { %590 = vmatpush.msra.mxu1 %v432_v59  ;;  %535 = vmatpush.msrb.mxu3 %v457_v13  ;;  %v403_v59 = vld [vmem:[%s1460_s4 + $0x170] sm:$0xff] }
  0x4c   :  { %508 = vmatpush.msrb.mxu2 %v421_v9  ;;  %v497_v45 = vunpack.c.l.bf16 %v403_v59  ;;  %v458_v9 = vunpack.c.h.bf16 %v1235_v5  ;;  %v498_v14 = vunpack.c.h.bf16 %v403_v59  ;;  %v398_v5 = vld [vmem:[%s1460_s4 + $0x148] sm:$0xff] }
  0x4d   :  { %591 = vmatpush.msra.mxu1 %v430_v63  ;;  %536 = vmatpush.msrb.mxu3 %v455_v17  ;;  %v1335_v63 = vld [vmem:[%s1460_s4 + $0x80] sm:$0xff]  ;;  %v489_v17 = vunpack.c.l.bf16 %v399_v1 }
  0x4e   :  { %266 = vmatmul.f32.gmra.mxu0 %v1066_v10  ;;  %295 = vmatmul.f32.gmra.mxu1 %v1071_v11  ;;  %v1259_v10 = vld [vmem:[%s1460_s4 + $0xc0] sm:$0xff]  ;;  %v422_v11 = vunpack.c.h.bf16 %v365_v2  ;;  %v462_v2 = vunpack.c.h.bf16 %v1212_v56  ;;  %v400_v56 = vld [vmem:[%s1460_s4 + $0x158] sm:$0xff] }
  0x4f   :  { %592 = vmatpush.msra.mxu1 %v428_v3  ;;  %509 = vmatpush.msrb.mxu2 %v419_v16  ;;  %v453_v23 = vunpack.c.l.bf16 %v1259_v10  ;;  %v437_v3 = vunpack.c.l.bf16 %v1335_v63  ;;  %v491_v13 = vunpack.c.l.bf16 %v400_v56  ;;  %v456_v16 = vunpack.c.h.bf16 %v1244_v12 }
  0x50   :  { %560 = vmatpush.msra.mxu0 %v497_v45  ;;  %v454_v18 = vunpack.c.h.bf16 %v1259_v10  ;;  %v396_v10 = vld [vmem:[%s1460_s4 + $0x138] sm:$0xff] }
  0x51   :  { %593 = vmatpush.msra.mxu1 %v426_v8  ;;  %510 = vmatpush.msrb.mxu2 %v417_v19  ;;  %v500_v8 = vunpack.c.h.bf16 %v404_v53  ;;  %v494_v19 = vunpack.c.h.bf16 %v401_v51  ;;  %v484_v47 = vunpack.c.h.bf16 %v396_v10 }
  0x52   :  { %537 = vmatpush.msrb.mxu3 %v453_v23  ;;  %561 = vmatpush.msra.mxu0 %v495_v4 }
  0x53   :  { %594 = vmatpush.msra.mxu1 %v424_v15  ;;  %511 = vmatpush.msrb.mxu2 %v415_v22  ;;  %v496_v15 = vunpack.c.h.bf16 %v402_v0  ;;  %v397_v22 = vld [vmem:[%s1460_s4 + $0x140] sm:$0xff]  ;;  %v390_v0 = vld [vmem:[%s1460_s4 + $0x108] sm:$0xff] }
  0x54   :  { %562 = vmatpush.msra.mxu0 %v493_v7  ;;  %v485_v23 = vunpack.c.l.bf16 %v397_v22  ;;  %v389_v7 = vld [vmem:[%s1460_s4 + $0x100] sm:$0xff] }
  0x55   :  { %595 = vmatpush.msra.mxu1 %v422_v11  ;;  %v487_v11 = vunpack.c.l.bf16 %v398_v5 }
  0x56   :  { %269 = vmatmul.f32.gmra.mxu0 %v1104_v20  ;;  %298 = vmatmul.f32.gmra.mxu1 %v1109_v21  ;;  %v1272_v20 = vld [vmem:[%s1460_s4 + $0xb8] sm:$0xff]  ;;  %v413_v21 = vunpack.c.l.bf16 %v361_v27  ;;  %v483_v27 = vunpack.c.l.bf16 %v396_v10 }
  0x57   :  { %596 = vmatpush.msra.mxu1 %v420_v24  ;;  %v451_v28 = vunpack.c.l.bf16 %v1272_v20  ;;  %563 = vmatpush.msra.mxu0 %v491_v13  ;;  %v452_v12 = vunpack.c.h.bf16 %v1272_v20  ;;  %v492_v24 = vunpack.c.h.bf16 %v400_v56  ;;  %v490_v20 = vunpack.c.h.bf16 %v399_v1 }
  0x58   :  { %512 = vmatpush.msrb.mxu2 %v413_v21  ;;  %v395_v21 = vld [vmem:[%s1460_s4 + $0x130] sm:$0xff] }
  0x59   :  { %597 = vmatpush.msra.mxu1 %v418_v25  ;;  %538 = vmatpush.msrb.mxu3 %v451_v28  ;;  %v1368_v25 = vld [vmem:[%s1458_s2] sm:$0x7]  ;;  %v448_v28 = vunpack.c.h.bf16 %v1290_v36  ;;  %v481_v32 = vunpack.c.l.bf16 %v395_v21  ;;  %v446_v36 = vunpack.c.h.bf16 %v1299_v42  ;;  %v482_v53 = vunpack.c.h.bf16 %v395_v21 }
  0x5a   :  { %513 = vmatpush.msrb.mxu2 %v411_v33  ;;  %564 = vmatpush.msra.mxu0 %v489_v17  ;;  %v394_v33 = vld [vmem:[%s1460_s4 + $0x128] sm:$0xff]  ;;  %v472_v17 = vunpack.c.h.bf16 %v390_v0 }
  0x5b   :  { %598 = vmatpush.msra.mxu1 %v416_v26 }
  0x5c   :  { %565 = vmatpush.msra.mxu0 %v487_v11 }
  0x5d   :  { %599 = vmatpush.msra.mxu1 %v414_v29  ;;  %v1378_v29 = vld [vmem:[%s1459_s3] sm:$0x7] }
  0x5e   :  { %272 = vmatmul.f32.gmra.mxu0 %v1142_v30  ;;  %301 = vmatmul.f32.gmra.mxu1 %v1147_v31  ;;  %v1281_v30 = vld [vmem:[%s1460_s4 + $0xb0] sm:$0xff]  ;;  %v1388_v41 = vperm.slane %v1378_v29, 0 }
  0x5f   :  { %v359_v31 = vld [vmem:[%s1460_s4 + $0x10] sm:$0xff]  ;;  %v449_v35 = vunpack.c.l.bf16 %v1281_v30  ;;  %600 = vmatpush.msra.mxu1 %v412_v34  ;;  %v450_v26 = vunpack.c.h.bf16 %v1281_v30  ;;  %566 = vmatpush.msra.mxu0 %v485_v23  ;;  %v488_v30 = vunpack.c.h.bf16 %v398_v5  ;;  %v470_v5 = vunpack.c.h.bf16 %v389_v7 }
  0x60   :  { %v409_v37 = vunpack.c.l.bf16 %v359_v31  ;;  %v410_v38 = vunpack.c.h.bf16 %v359_v31  ;;  %v1381_v31 = vperm.slane %v1368_v25, 0 }
  0x61   :  { %539 = vmatpush.msrb.mxu3 %v449_v35  ;;  %567 = vmatpush.msra.mxu0 %v483_v27 }
  0x62   :  { %514 = vmatpush.msrb.mxu2 %v409_v37  ;;  %601 = vmatpush.msra.mxu1 %v410_v38  ;;  %v479_v37 = vunpack.c.l.bf16 %v394_v33  ;;  %v486_v38 = vunpack.c.h.bf16 %v397_v22 }
  0x63   :  { %540 = vmatpush.msrb.mxu3 %v447_v40  ;;  %568 = vmatpush.msra.mxu0 %v481_v32 }
  0x64   :  { %515 = vmatpush.msrb.mxu2 %v407_v43  ;;  %602 = vmatpush.msra.mxu1 %v408_v49  ;;  %v393_v43 = vld [vmem:[%s1460_s4 + $0x120] sm:$0xff]  ;;  %v392_v49 = vld [vmem:[%s1460_s4 + $0x118] sm:$0xff] }
  0x65   :  { %541 = vmatpush.msrb.mxu3 %v445_v44  ;;  %v444_v44 = vunpack.c.h.bf16 %v1309_v48  ;;  %569 = vmatpush.msra.mxu0 %v479_v37  ;;  %v391_v48 = vld [vmem:[%s1460_s4 + $0x110] sm:$0xff]  ;;  %v478_v4 = vunpack.c.h.bf16 %v393_v43  ;;  %v476_v13 = vunpack.c.h.bf16 %v392_v49 }
  0x66   :  { %516 = vmatpush.msrb.mxu2 %v405_v50  ;;  %603 = vmatpush.msra.mxu1 %v406_v55  ;;  %v442_v50 = vunpack.c.h.bf16 %v1315_v39  ;;  %v1404_v55 = vperm.slane %v1368_v25, 1  ;;  %v473_v59 = vunpack.c.l.bf16 %v391_v48  ;;  %v480_v39 = vunpack.c.h.bf16 %v394_v33 }
  0x67   :  { %542 = vmatpush.msrb.mxu3 %v443_v52  ;;  %v475_v52 = vunpack.c.l.bf16 %v392_v49  ;;  %v474_v1 = vunpack.c.h.bf16 %v391_v48 }
  0x68   :  { %617 = vmatpush.msra.mxu2 %v468_v46  ;;  %v477_v46 = vunpack.c.l.bf16 %v393_v43 }
  0x69   :  { %543 = vmatpush.msrb.mxu3 %v441_v57  ;;  %v440_v57 = vunpack.c.h.bf16 %v1325_v58  ;;  %v471_v58 = vunpack.c.l.bf16 %v390_v0 }
  0x6a   :  { %618 = vmatpush.msra.mxu2 %v466_v54  ;;  %570 = vmatpush.msra.mxu0 %v477_v46 }
  0x6b   :  { %544 = vmatpush.msrb.mxu3 %v439_v61 }
  0x6c   :  { %619 = vmatpush.msra.mxu2 %v464_v62  ;;  %v1408_v62 = vperm.slane %v1378_v29, 1  ;;  %571 = vmatpush.msra.mxu0 %v475_v52 }
  0x6d   :  { %545 = vmatpush.msrb.mxu3 %v437_v3  ;;  %v438_v3 = vunpack.c.h.bf16 %v1335_v63 }
  0x6e   :  { %620 = vmatpush.msra.mxu2 %v462_v2  ;;  %572 = vmatpush.msra.mxu0 %v473_v59 }
  0x6f   :  { %646 = vmatpush.msra.mxu3 %v500_v8 }
  0x70   :  { %621 = vmatpush.msra.mxu2 %v460_v6  ;;  %573 = vmatpush.msra.mxu0 %v471_v58 }
  0x71   :  { %647 = vmatpush.msra.mxu3 %v498_v14 }
  0x72   :  { %622 = vmatpush.msra.mxu2 %v458_v9  ;;  %v469_v9 = vunpack.c.l.bf16 %v389_v7 }
  0x73   :  { %648 = vmatpush.msra.mxu3 %v496_v15 }
  0x74   :  { %623 = vmatpush.msra.mxu2 %v456_v16  ;;  %574 = vmatpush.msra.mxu0 %v469_v9 }
  0x75   :  { %649 = vmatpush.msra.mxu3 %v494_v19 }
  0x76   :  { %624 = vmatpush.msra.mxu2 %v454_v18 }
  0x77   :  { %650 = vmatpush.msra.mxu3 %v492_v24 }
  0x78   :  { %625 = vmatpush.msra.mxu2 %v452_v12 }
  0x79   :  { %651 = vmatpush.msra.mxu3 %v490_v20 }
  0x7a   :  { %626 = vmatpush.msra.mxu2 %v450_v26 }
  0x7b   :  { %652 = vmatpush.msra.mxu3 %v488_v30 }
  0x7c   :  { %627 = vmatpush.msra.mxu2 %v448_v28 }
  0x7d   :  { %653 = vmatpush.msra.mxu3 %v486_v38 }
  0x7e   :  { %628 = vmatpush.msra.mxu2 %v446_v36 }
  0x7f   :  { %654 = vmatpush.msra.mxu3 %v484_v47 }
  0x80   :  { %629 = vmatpush.msra.mxu2 %v444_v44 }
  0x81   :  { %655 = vmatpush.msra.mxu3 %v482_v53 }
  0x82   :  { %630 = vmatpush.msra.mxu2 %v442_v50  ;;  %v309_v50 = vperm.slane %v1368_v25, 2 }
  0x83   :  { %656 = vmatpush.msra.mxu3 %v480_v39 }
  0x84   :  { %631 = vmatpush.msra.mxu2 %v440_v57 }
  0x85   :  { %657 = vmatpush.msra.mxu3 %v478_v4 }
  0x86   :  { %632 = vmatpush.msra.mxu2 %v438_v3 }
  0x87   :  { %658 = vmatpush.msra.mxu3 %v476_v13 }
  0x89   :  { %659 = vmatpush.msra.mxu3 %v474_v1 }
  0x8b   :  { %660 = vmatpush.msra.mxu3 %v472_v17 }
  0x8d   :  { %661 = vmatpush.msra.mxu3 %v470_v5 }
  0x9f   :  { %v148_v34 = vpop.f32.mrf.mxu0  ;;  %v177_v35 = vpop.f32.mrf.mxu1 }
  0xa0   :  { %v178_v40 = vadd.f32 %v177_v35, %v148_v34 }
  0xa2   :  { %v313_v42 = vmul.f32 %v1381_v31, %v178_v40 }
  0xa4   :  { %v333_v54 = vadd.f32 %v1388_v41, %v313_v42 }
  0xa6   :  { %v206_v60 = vpop.f32.mrf.mxu2  ;;  %v235_v61 = vpop.f32.mrf.mxu3  ;;  %v345_v45 = vmax.f32 %v333_v54, 0.0 }
  0xa7   :  { %v236_v2 = vadd.f32 %v235_v61, %v206_v60 }
  0xa8   :  { %v151_v51 = vpop.f32.mrf.mxu0  ;;  %v180_v6 = vpop.f32.mrf.mxu1  ;;  %517 = vmatmul.f32.vlgmr.msrb.gmra.mxu2 %v345_v45  ;;  %604 = vmatmul.f32.vlgmr.msra.gmra.mxu1 %v345_v45 }
  0xa9   :  { %v314_v8 = vmul.f32 %v1404_v55, %v236_v2  ;;  %v181_v56 = vadd.f32 %v180_v6, %v151_v51 }
  0xab   :  { %v316_v63 = vmul.f32 %v1381_v31, %v181_v56  ;;  %v1420_v14 = vadd.f32 %v1408_v62, %v314_v8 }
  0xad   :  { %v346_v15 = vmax.f32 %v1420_v14, 0.0  ;;  %v336_v16 = vadd.f32 %v1388_v41, %v316_v63 }
  0xaf   :  { %v209_v18 = vpop.f32.mrf.mxu2  ;;  %v238_v11 = vpop.f32.mrf.mxu3  ;;  %546 = vmatmul.f32.vlgmr.msrb.gmra.mxu3 %v346_v15  ;;  %v348_v19 = vmax.f32 %v336_v16, 0.0 }
  0xb0   :  { %v239_v22 = vadd.f32 %v238_v11, %v209_v18 }
  0xb1   :  { %v154_v12 = vpop.f32.mrf.mxu0  ;;  %v183_v23 = vpop.f32.mrf.mxu1  ;;  %520 = vmatmul.f32.gmra.mxu2 %v348_v19  ;;  %607 = vmatmul.f32.gmra.mxu1 %v348_v19 }
  0xb2   :  { %v317_v24 = vmul.f32 %v1404_v55, %v239_v22  ;;  %v184_v10 = vadd.f32 %v183_v23, %v154_v12 }
  0xb4   :  { %v319_v26 = vmul.f32 %v1381_v31, %v184_v10  ;;  %v337_v27 = vadd.f32 %v1408_v62, %v317_v24 }
  0xb6   :  { %v349_v20 = vmax.f32 %v337_v27, 0.0  ;;  %v339_v21 = vadd.f32 %v1388_v41, %v319_v26 }
  0xb8   :  { %v212_v28 = vpop.f32.mrf.mxu2  ;;  %v241_v32 = vpop.f32.mrf.mxu3  ;;  %549 = vmatmul.f32.gmra.mxu3 %v349_v20  ;;  %v351_v30 = vmax.f32 %v339_v21, 0.0  ;;  %v677_v21 = vld [vmem:[%s1461_s5 + $0x10] sm:$0xff] }
  0xb9   :  { %v242_v33 = vadd.f32 %v241_v32, %v212_v28 }
  0xba   :  { %v157_v34 = vpop.f32.mrf.mxu0  ;;  %v186_v35 = vpop.f32.mrf.mxu1  ;;  %523 = vmatmul.f32.gmra.mxu2 %v351_v30  ;;  %610 = vmatmul.f32.gmra.mxu1 %v351_v30 }
  0xbb   :  { %v320_v36 = vmul.f32 %v1404_v55, %v242_v33  ;;  %v187_v37 = vadd.f32 %v186_v35, %v157_v34  ;;  %v676_v35 = vld [vmem:[%s1461_s5 + $0x8] sm:$0xff] }
  0xbd   :  { %v322_v38 = vmul.f32 %v1381_v31, %v187_v37  ;;  %v340_v40 = vadd.f32 %v1408_v62, %v320_v36  ;;  %v329_v31 = vperm.slane %v1378_v29, 2 }
  0xbf   :  { %v352_v43 = vmax.f32 %v340_v40, 0.0  ;;  %v342_v44 = vadd.f32 %v1388_v41, %v322_v38  ;;  %v683_v40 = vunpack.c.l.bf16 %v677_v21 }
  0xc1   :  { %v215_v46 = vpop.f32.mrf.mxu2  ;;  %v244_v47 = vpop.f32.mrf.mxu3  ;;  %552 = vmatmul.f32.gmra.mxu3 %v352_v43  ;;  %v354_v42 = vmax.f32 %v342_v44, 0.0  ;;  %v675_v44 = vld [vmem:[%s1461_s5] sm:$0xff] }
  0xc2   :  { %v245_v49 = vadd.f32 %v244_v47, %v215_v46 }
  0xc3   :  { %v264_v52 = vpop.f32.mrf.mxu0  ;;  %v293_v53 = vpop.f32.mrf.mxu1  ;;  %526 = vmatmul.f32.gmra.mxu2 %v354_v42  ;;  %613 = vmatmul.f32.gmra.mxu1 %v354_v42  ;;  %v681_v42 = vunpack.c.l.bf16 %v676_v35 }
  0xc4   :  { %v323_v54 = vmul.f32 %v1404_v55, %v245_v49  ;;  %v294_v48 = vadd.f32 %v293_v53, %v264_v52  ;;  %v679_v53 = vunpack.c.l.bf16 %v675_v44 }
  0xc6   :  { %v315_v57 = vmul.f32 %v309_v50, %v294_v48  ;;  %v343_v59 = vadd.f32 %v1408_v62, %v323_v54 }
  0xc8   :  { %v335_v41 = vadd.f32 %v329_v31, %v315_v57  ;;  %v355_v39 = vmax.f32 %v343_v59, 0.0 }
  0xca   :  { %v347_v60 = vmax.f32 %v335_v41, 0.0  ;;  %555 = vmatmul.f32.gmra.mxu3 %v355_v39 }
  0xcb   :  { %v267_v61 = vpop.f32.mrf.mxu0  ;;  %v296_v45 = vpop.f32.mrf.mxu1  ;;  %633 = vmatmul.f32.vlgmr.msra.gmra.mxu2 %v346_v15 }
  0xcc   :  { %v297_v25 = vadd.f32 %v296_v45, %v267_v61  ;;  %575 = vmatmul.f32.vlgmr.msra.gmra.mxu0 %v347_v60  ;;  %v695_v61 = vld [vmem:[%s1462_s6] sm:$0x3]  ;;  %s792_s6 = smov [#allocation2]  }
  0xcd   :  { %s752_s30 = sshll.u32 %s792_s6, 4  ;;  %s753_s30 = int_to_ptr.vmem [resolvable:$true] %s752_s30 }
  0xce   :  { %v318_v0 = vmul.f32 %v309_v50, %v297_v25 }
  0xd0   :  { %v338_v2 = vadd.f32 %v329_v31, %v318_v0 }
  0xd2   :  { %662 = vmatmul.f32.vlgmr.msra.gmra.mxu3 %v347_v60  ;;  %v350_v3 = vmax.f32 %v338_v2, 0.0  ;;  %v684_v2 = vunpack.c.h.bf16 %v677_v21 }
  0xd3   :  { %v270_v55 = vpop.f32.mrf.mxu0  ;;  %v299_v58 = vpop.f32.mrf.mxu1  ;;  %636 = vmatmul.f32.gmra.mxu2 %v349_v20  ;;  %v678_v20 = vld [vmem:[%s1461_s5 + $0x18] sm:$0xff] }
  0xd4   :  { %v300_v29 = vadd.f32 %v299_v58, %v270_v55  ;;  %578 = vmatmul.f32.gmra.mxu0 %v350_v3  ;;  %v685_v33 = vunpack.c.l.bf16 %v678_v20  ;;  %v686_v60 = vunpack.c.h.bf16 %v678_v20 }
  0xd6   :  { %v321_v4 = vmul.f32 %v309_v50, %v300_v29  ;;  %v682_v29 = vunpack.c.h.bf16 %v676_v35 }
  0xd8   :  { %v341_v62 = vadd.f32 %v329_v31, %v321_v4 }
  0xda   :  { %665 = vmatmul.f32.gmra.mxu3 %v350_v3  ;;  %v353_v51 = vmax.f32 %v341_v62, 0.0 }
  0xdb   :  { %v273_v6 = vpop.f32.mrf.mxu0  ;;  %v302_v7 = vpop.f32.mrf.mxu1  ;;  %639 = vmatmul.f32.gmra.mxu2 %v352_v43 }
  0xdc   :  { %v303_v8 = vadd.f32 %v302_v7, %v273_v6  ;;  %581 = vmatmul.f32.gmra.mxu0 %v353_v51 }
  0xde   :  { %v324_v56 = vmul.f32 %v309_v50, %v303_v8 }
  0xe0   :  { %v344_v9 = vadd.f32 %v329_v31, %v324_v56 }
  0xe2   :  { %668 = vmatmul.f32.gmra.mxu3 %v353_v51  ;;  %v356_v13 = vmax.f32 %v344_v9, 0.0  ;;  %v680_v51 = vunpack.c.h.bf16 %v675_v44 }
  0xe3   :  { %642 = vmatmul.f32.gmra.mxu2 %v355_v39 }
  0xe4   :  { %584 = vmatmul.f32.gmra.mxu0 %v356_v13 }
  0xea   :  { %671 = vmatmul.f32.gmra.mxu3 %v356_v13 }
 0x125   :  { %v605_v11 = vpop.f32.mrf.mxu1 }
 0x12b   :  { %v518_v63 = vpop.f32.mrf.mxu2 }
 0x12e   :  { %v608_v10 = vpop.f32.mrf.mxu1 }
 0x132   :  { %v547_v14 = vpop.f32.mrf.mxu3 }
 0x133   :  { %v548_v46 = vadd.f32 %v547_v14, %v518_v63 }
 0x134   :  { %v521_v1 = vpop.f32.mrf.mxu2 }
 0x137   :  { %v611_v34 = vpop.f32.mrf.mxu1 }
 0x13b   :  { %v550_v15 = vpop.f32.mrf.mxu3 }
 0x13c   :  { %v551_v37 = vadd.f32 %v550_v15, %v521_v1 }
 0x13d   :  { %v524_v16 = vpop.f32.mrf.mxu2 }
 0x140   :  { %v614_v59 = vpop.f32.mrf.mxu1 }
 0x144   :  { %v553_v17 = vpop.f32.mrf.mxu3 }
 0x145   :  { %v554_v32 = vadd.f32 %v553_v17, %v524_v16 }
 0x146   :  { %v527_v5 = vpop.f32.mrf.mxu2 }
 0x149   :  { %v576_v18 = vpop.f32.mrf.mxu0 }
 0x14a   :  { %v577_v52 = vadd.f32 %v576_v18, %v548_v46 }
 0x14c   :  { %v687_v57 = vmul.f32 %v679_v53, %v577_v52 }
 0x14d   :  { %v556_v19 = vpop.f32.mrf.mxu3 }
 0x14e   :  { %v634_v22 = vpop.f32.mrf.mxu2  ;;  %v557_v30 = vadd.f32 %v556_v19, %v527_v5 }
 0x14f   :  { %v635_v55 = vadd.f32 %v634_v22, %v605_v11 }
 0x151   :  { %v579_v12 = vpop.f32.mrf.mxu0 }
 0x152   :  { %v580_v47 = vadd.f32 %v579_v12, %v551_v37 }
 0x154   :  { %v689_v48 = vmul.f32 %v681_v42, %v580_v47 }
 0x155   :  { %v663_v23 = vpop.f32.mrf.mxu3 }
 0x156   :  { %v637_v24 = vpop.f32.mrf.mxu2  ;;  %v664_v62 = vadd.f32 %v663_v23, %v635_v55 }
 0x157   :  { %v638_v25 = vadd.f32 %v637_v24, %v608_v10 }
 0x158   :  { %v688_v8 = vmul.f32 %v680_v51, %v664_v62 }
 0x159   :  { %v582_v26 = vpop.f32.mrf.mxu0 }
 0x15a   :  { %v583_v38 = vadd.f32 %v582_v26, %v554_v32 }
 0x15c   :  { %v691_v54 = vmul.f32 %v683_v40, %v583_v38 }
 0x15d   :  { %v666_v27 = vpop.f32.mrf.mxu3 }
 0x15e   :  { %v640_v28 = vpop.f32.mrf.mxu2  ;;  %v667_v58 = vadd.f32 %v666_v27, %v638_v25 }
 0x15f   :  { %v641_v41 = vadd.f32 %v640_v28, %v611_v34 }
 0x160   :  { %v690_v7 = vmul.f32 %v682_v29, %v667_v58 }
 0x161   :  { %v585_v36 = vpop.f32.mrf.mxu0 }
 0x162   :  { %v586_v43 = vadd.f32 %v585_v36, %v557_v30 }
 0x164   :  { %v693_v49 = vmul.f32 %v685_v33, %v586_v43 }
 0x165   :  { %v669_v50 = vpop.f32.mrf.mxu3 }
 0x166   :  { %712 = vmatpush.msrb.mxu0 %v693_v49  ;;  %v643_v31 = vpop.f32.mrf.mxu2  ;;  %v670_v0 = vadd.f32 %v669_v50, %v641_v41 }
 0x167   :  { %v644_v39 = vadd.f32 %v643_v31, %v614_v59 }
 0x168   :  { %713 = vmatpush.msrb.mxu0 %v691_v54  ;;  %v692_v6 = vmul.f32 %v684_v2, %v670_v0 }
 0x16a   :  { %714 = vmatpush.msrb.mxu0 %v689_v48 }
 0x16c   :  { %715 = vmatpush.msrb.mxu0 %v687_v57 }
 0x16d   :  { %v672_v45 = vpop.f32.mrf.mxu3  ;;  %763 = vmatmul.msk.f32.vlgmr.msrb.gmra.mxu0 %vm696_vm0, %v695_v61 }
 0x16e   :  { %v673_v3 = vadd.f32 %v672_v45, %v644_v39 }
 0x170   :  { %v694_v4 = vmul.f32 %v686_v60, %v673_v3 }
 0x172   :  { %732 = vmatpush.msrb.mxu1 %v694_v4 }
 0x174   :  { %733 = vmatpush.msrb.mxu1 %v692_v6 }
 0x176   :  { %734 = vmatpush.msrb.mxu1 %v690_v7 }
 0x178   :  { %735 = vmatpush.msrb.mxu1 %v688_v8 }
 0x179   :  { %764 = vmatmul.msk.f32.vlgmr.msrb.gmra.mxu1 %vm696_vm0, %v695_v61 }
 0x1ea   :  { %v717_v9 = vpop.f32.mrf.mxu0 }
 0x1f6   :  { %v737_v56 = vpop.f32.mrf.mxu1 }
 0x1f7   :  { %v742_v13 = vrot.slane %v737_v56, 6 }
 0x1f9   :  { %v744_v63 = vsel %vm743_vm1, %v717_v9, %v742_v13 }
 0x1fa   :  { %746 = vst [vmem:[#allocation2] sm:$0xf] %v744_v63 }
 0x1fb   :  { %757 = dma.vmem_to_hbm [thread:$0]  %s753_s30, 64, %s755_s10, [#allocation3]  }
 0x1fc   :  { %790 = dma.done.wait [#allocation3], 64  }
 0x1fd   :  { %791 = vsyncadd [#allocation3], 4294967232 }
 0x1fe   :  { %762 = vsyncpa [#allocation3], 1 }

</bundles_post_ra>
